<compile_context>
chip_gen: v5e
topology: v5e:2x2
jax: 0.10.0
libtpu: 0.0.40
codegen_flags: <defaults>
</compile_context>

<pallas_src>
import jax
import jax.numpy as jnp
from jax.experimental import pallas as pl
from jax.experimental.pallas import tpu as pltpu


_LANE = 128                              # TPU lane width
_MAX_LANE_WIDTH = 8192                   # cap on the lane-dense last dim
_BLOCK_BYTES_TARGET = 4 * 1024 * 1024    # per-array block budget (~4 MiB)
_VMEM_LIMIT_BYTES = 32 * 1024 * 1024     # explicit scoped-VMEM limit


def _identity_copy_kernel(xt_ref, out_ref):
    """Placeholder forward: identity pass-through of the X_t tile."""
    out_ref[...] = xt_ref[...]


def _pick_lane_width(total):
    """Largest multiple of 128 that divides `total` (capped), else None."""
    if total % _LANE != 0:
        return None
    upper = min(_MAX_LANE_WIDTH, total)
    upper -= upper % _LANE
    for c in range(upper, _LANE - 1, -_LANE):
        if total % c == 0:
            return c
    return _LANE  # unreachable: 128 always divides when total % 128 == 0


def diffusion_model_forward(X_0, X_t, batch, *, elide_copy=False):
    """JAX/Pallas equivalent of DiffusionModel.forward(X_0, X_t, batch).

    X_0 and `batch` are accepted for signature parity only (the template
    forward defines no math).  With `elide_copy=True` the identity is returned
    with zero kernel launches — the true fastest version of "no semantics".
    """
    del X_0, batch  # unused by the template forward (see module TODO)

    if elide_copy:
        return X_t

    orig_shape = X_t.shape
    total = int(X_t.size)
    itemsize = jnp.dtype(X_t.dtype).itemsize

    # --- lane-dense 2-D view -------------------------------------------------
    cols = _pick_lane_width(total)
    if cols is None:
        # Total size not a multiple of 128: single whole-array block (block
        # shape == full array dims satisfies the (8,128) tiling rule).
        rows, cols = 1, total
    else:
        rows = total // cols
    flat = X_t.reshape(rows, cols)

    # --- row tiling against the VMEM budget ----------------------------------
    row_bytes = cols * itemsize
    if rows * row_bytes <= _BLOCK_BYTES_TARGET:
        tm = rows                                   # whole array, grid of 1
    else:
        tm = max(8, (_BLOCK_BYTES_TARGET // row_bytes) // 8 * 8)
    grid = (pl.cdiv(rows, tm),)

    out_flat = pl.pallas_call(
        _identity_copy_kernel,
        out_shape=jax.ShapeDtypeStruct(flat.shape, flat.dtype),
        grid=grid,
        in_specs=[pl.BlockSpec((tm, cols), lambda i: (i, 0))],
        out_specs=pl.BlockSpec((tm, cols), lambda i: (i, 0)),
        compiler_params=pltpu.CompilerParams(
            dimension_semantics=("parallel",),
            vmem_limit_bytes=_VMEM_LIMIT_BYTES,
        ),
    )(flat)

    return out_flat.reshape(orig_shape)


if __name__ == "__main__":
    key = jax.random.PRNGKey(0)
    k0, k1 = jax.random.split(key)

    # Small shapes consistent with an image-diffusion state: (N, C, H, W)
    N, C, H, W = 2, 4, 16, 16
    X_0 = jax.random.normal(k0, (N, C, H, W), dtype=jnp.float32)
    X_t = jax.random.normal(k1, (N, C, H, W), dtype=jnp.float32)
    batch = jnp.arange(N, dtype=jnp.int32)  # placeholder batch indices

    out = diffusion_model_forward(X_0, X_t, batch)
    out = jax.block_until_ready(out)

    # Sanity check: the placeholder kernel is an identity on X_t.
    assert out.shape == X_t.shape and out.dtype == X_t.dtype
    assert bool(jnp.allclose(out, X_t))

    # Zero-cost path also works.
    out2 = jax.block_until_ready(
        diffusion_model_forward(X_0, X_t, batch, elide_copy=True))
    assert bool(jnp.allclose(out2, X_t))

    print("KERNEL_OK")
</pallas_src>

<mosaic_0001>
module attributes {stable_mosaic.version = 11 : i64} {
  func.func @_identity_copy_kernel(%arg0: i32, %arg1: memref<1x2048xf32, #tpu.memory_space<vmem>>, %arg2: memref<1x2048xf32, #tpu.memory_space<vmem>>) attributes {dimension_semantics = [#tpu.dimension_semantics<parallel>], iteration_bounds = array<i64: 1>, scalar_prefetch = 0 : i64, scratch_operands = 0 : i64, tpu.core_type = #tpu.core_type<tc>, window_params = [{transform_indices = @transform_0, window_bounds = array<i64: 1, 2048>}, {transform_indices = @transform_1, window_bounds = array<i64: 1, 2048>}]} {
    %c0 = arith.constant 0 : index
    %c0_0 = arith.constant 0 : index
    %0 = vector.load %arg1[%c0, %c0_0] : memref<1x2048xf32, #tpu.memory_space<vmem>>, vector<1x2048xf32>
    %c0_1 = arith.constant 0 : index
    %c0_2 = arith.constant 0 : index
    %1 = vector.load %arg2[%c0_1, %c0_2] : memref<1x2048xf32, #tpu.memory_space<vmem>>, vector<1x2048xf32>
    tpu.vector_store %arg2[%c0_1, %c0_2], %0 {strides = array<i32>} : memref<1x2048xf32, #tpu.memory_space<vmem>>, vector<1x2048xf32>,
    return
  }
  func.func @transform_0(%arg0: i32) -> (i32, i32) {
    %c0_i32 = arith.constant 0 : i32
    %c0_i32_0 = arith.constant 0 : i32
    return %arg0, %c0_i32 : i32, i32
  }
  func.func @transform_1(%arg0: i32) -> (i32, i32) {
    %c0_i32 = arith.constant 0 : i32
    %c0_i32_0 = arith.constant 0 : i32
    return %arg0, %c0_i32 : i32, i32
  }
}

</mosaic_0001>

<bundles_post_ra>
// kernel: tpu_custom_call.1
= control target key start
LH: loop header
LB: loop body
LE: loop exit
PB: predicated region body
PF: predicated region fallthrough
CT: control target
= control target key end

     0   :  { %6 = vsyncpa [#allocation3], 0  ;;  %s116_s0 = inlined_call_operand.hbm [shape: f32[1,2048], index: 0, kind: input, shape index: {}]   ;;  %s117_s1 = inlined_call_operand.hbm [shape: f32[1,2048], index: 1, kind: output, shape index: {}]  }
   0x1   :  { %7 = vsyncpa [#allocation4], 0  ;;  %s13_s8 = sshll.u32 %s116_s0, 4  ;;  %s98_s9 = smov [#allocation2]   ;;  %s14_s8 = int_to_ptr.hbm [resolvable:$true] %s13_s8 }
   0x2   :  { %s15_s10 = sshll.u32 %s98_s9, 4  ;;  %s16_s10 = int_to_ptr.vmem [resolvable:$true] %s15_s10 }
   0x3   :  { %18 = dma.hbm_to_vmem [thread:$0]  %s14_s8, 256, %s16_s10, [#allocation3]  }
   0x4   :  { %94 = dma.done.wait [#allocation3], 256  }
   0x5   :  { %95 = vsyncadd [#allocation3], 4294967040  ;;  %s99_s11 = smov [#allocation5]   ;;  %s34_s15 = sshll.u32 %s117_s1, 4  ;;  %v23_v0 = vld [vmem:[#allocation2] sm:$0xff]  ;;  %v24_v1 = vld [vmem:[#allocation2 + $0x8] sm:$0xff]  ;;  %s35_s15 = int_to_ptr.hbm [resolvable:$true] %s34_s15 }
   0x6   :  { %s32_s12 = sshll.u32 %s99_s11, 4  ;;  %25 = vst [vmem:[#allocation5] sm:$0xff] %v23_v0  ;;  %s33_s12 = int_to_ptr.vmem [resolvable:$true] %s32_s12 }
   0x7   :  { %26 = vst [vmem:[#allocation5 + $0x8] sm:$0xff] %v24_v1 }
   0x8   :  { %37 = dma.vmem_to_hbm [thread:$0]  %s33_s12, 256, %s35_s15, [#allocation4]  }
   0x9   :  { %96 = dma.done.wait [#allocation4], 256  }
   0xa   :  { %97 = vsyncadd [#allocation4], 4294967040 }
   0xb   :  { %42 = vsyncpa [#allocation3], 1 }
   0xc   :  { %43 = vsyncpa [#allocation4], 1 }

</bundles_post_ra>
